<compile_context>
chip_gen: v5e
topology: v5e:2x2
jax: 0.10.0
libtpu: 0.0.40
codegen_flags: <defaults>
</compile_context>

<pallas_src>
import numpy as np
import jax
import jax.numpy as jnp
from jax import lax
from jax.experimental import pallas as pl
from jax.experimental.pallas import tpu as pltpu

HIDDEN = 32           # hidden_size
NUM_HEADS = 4         # fixed by the module (unused numerically: seq_len == 1)
FFN_HIDDEN = HIDDEN * 4
EPS = 1e-5            # nn.LayerNorm default eps

# Row layout of the packed (6, H) bias/LayerNorm vector array.
_ROW_B_ATTN, _ROW_G1, _ROW_BE1, _ROW_B2, _ROW_G2, _ROW_BE2 = range(6)


def _round_up(x, m):
    return (x + m - 1) // m * m


def _layernorm(x, gamma, beta):
    mu = jnp.mean(x, axis=-1, keepdims=True)
    var = jnp.mean((x - mu) ** 2, axis=-1, keepdims=True)
    return (x - mu) * lax.rsqrt(var + EPS) * gamma + beta


def cross_attention_kernel(q_ref, kv_ref,
                           w_attn_ref, vecs_ref,
                           w1_ref, b1_ref, w2_ref,
                           out_ref):
    q = q_ref[...]
    kv = kv_ref[...]
    vecs = vecs_ref[...]                      # (6, H) packed small vectors

    b_attn = vecs[_ROW_B_ATTN:_ROW_B_ATTN + 1, :]
    g1 = vecs[_ROW_G1:_ROW_G1 + 1, :]
    be1 = vecs[_ROW_BE1:_ROW_BE1 + 1, :]
    b2 = vecs[_ROW_B2:_ROW_B2 + 1, :]
    g2 = vecs[_ROW_G2:_ROW_G2 + 1, :]
    be2 = vecs[_ROW_BE2:_ROW_BE2 + 1, :]

    # --- attention (softmax over 1 key == 1): fused V∘O projection ---
    attn_out = jnp.dot(kv, w_attn_ref[...],
                       preferred_element_type=jnp.float32) + b_attn
    # dropout == identity (eval mode)

    # --- residual + LayerNorm 1 ---
    out1 = _layernorm(q + attn_out, g1, be1)

    # --- FFN: Linear(H,4H) -> ReLU -> (Dropout=id) -> Linear(4H,H) ---
    h = jnp.dot(out1, w1_ref[...], preferred_element_type=jnp.float32) + b1_ref[...]
    h = jnp.maximum(h, 0.0)
    ffn = jnp.dot(h, w2_ref[...], preferred_element_type=jnp.float32) + b2

    # --- residual + LayerNorm 2 ---
    out_ref[...] = _layernorm(out1 + ffn, g2, be2).astype(out_ref.dtype)


def prepare_params(raw):
    """Fold V∘O projection and pack the tiny (1, H) vectors once, offline."""
    w_attn = raw["wv_t"] @ raw["wo_t"]                       # (H, H)
    b_attn = raw["bv"] @ raw["wo_t"] + raw["bo"]             # (1, H)
    vecs = jnp.concatenate(
        [b_attn, raw["g1"], raw["b1_ln"], raw["b2"], raw["g2"], raw["b2_ln"]],
        axis=0)                                              # (6, H)
    return {
        "w_attn": w_attn,
        "vecs": vecs,
        "w1_t": raw["w1_t"],
        "b1": raw["b1"],
        "w2_t": raw["w2_t"],
    }


def cross_attention_forward(query, key_value, prepared, *, block_b=512):
    """query, key_value: [B, H] float32 -> [B, H] float32."""
    B, H = query.shape
    assert H == HIDDEN

    # Batch tile: multiple of 8 (sublane), capped at block_b.
    TB = min(block_b, _round_up(B, 8))
    Bp = _round_up(B, TB)
    if Bp != B:
        pad = ((0, Bp - B), (0, 0))
        query = jnp.pad(query, pad)
        key_value = jnp.pad(key_value, pad)
    nb = Bp // TB

    w_attn = prepared["w_attn"]
    vecs = prepared["vecs"]
    w1_t = prepared["w1_t"]
    b1 = prepared["b1"]
    w2_t = prepared["w2_t"]

    def act_spec():
        return pl.BlockSpec((TB, H), lambda i: (i, 0))

    def resident_spec(arr):
        # Weight-like input: whole array in VMEM, same block every grid step
        # (stays resident; no re-DMA across batch tiles).
        return pl.BlockSpec(arr.shape, lambda i: (0,) * arr.ndim)

    out = pl.pallas_call(
        cross_attention_kernel,
        out_shape=jax.ShapeDtypeStruct((Bp, H), jnp.float32),
        grid=(nb,),
        in_specs=[
            act_spec(),                # query
            act_spec(),                # key_value
            resident_spec(w_attn),
            resident_spec(vecs),
            resident_spec(w1_t),
            resident_spec(b1),
            resident_spec(w2_t),
        ],
        out_specs=pl.BlockSpec((TB, H), lambda i: (i, 0)),
        compiler_params=pltpu.CompilerParams(
            dimension_semantics=("parallel",),   # v7x: shard batch axis over 2 TCs
            vmem_limit_bytes=32 * 1024 * 1024,
        ),
    )(query, key_value, w_attn, vecs, w1_t, b1, w2_t)

    return out[:B] if Bp != B else out


def reference_forward(query, key_value, p):
    """Pure-JAX reference with the original (unfused) math (eval-mode dropout)."""
    q = query
    kv = key_value
    v_p = kv @ p["wv_t"] + p["bv"]            # softmax over 1 key == 1
    attn_out = v_p @ p["wo_t"] + p["bo"]

    def ln(x, g, b):
        mu = jnp.mean(x, axis=-1, keepdims=True)
        var = jnp.mean((x - mu) ** 2, axis=-1, keepdims=True)
        return (x - mu) / jnp.sqrt(var + EPS) * g + b

    out1 = ln(q + attn_out, p["g1"], p["b1_ln"])
    h = jnp.maximum(out1 @ p["w1_t"] + p["b1"], 0.0)
    ffn = h @ p["w2_t"] + p["b2"]
    return ln(out1 + ffn, p["g2"], p["b2_ln"])


def make_params(key):
    ks = jax.random.split(key, 8)
    H, F = HIDDEN, FFN_HIDDEN

    def nrm(k, shape, scale=0.05):
        return jax.random.normal(k, shape, dtype=jnp.float32) * scale

    # Projection weights stored pre-transposed so the math is x @ W^T == x @ wT.
    # Q/K in-projections are omitted entirely: with seq_len == 1 they cannot
    # affect the output (softmax over a single score is 1).
    return {
        "wv_t": nrm(ks[0], (H, H)), "bv": nrm(ks[1], (1, H)),
        "wo_t": nrm(ks[2], (H, H)), "bo": nrm(ks[3], (1, H)),
        "g1": jnp.ones((1, H), jnp.float32), "b1_ln": jnp.zeros((1, H), jnp.float32),
        "w1_t": nrm(ks[4], (H, F)), "b1": nrm(ks[5], (1, F)),
        "w2_t": nrm(ks[6], (F, H)), "b2": nrm(ks[7], (1, H)),
        "g2": jnp.ones((1, H), jnp.float32), "b2_ln": jnp.zeros((1, H), jnp.float32),
    }


if __name__ == "__main__":
    root = jax.random.PRNGKey(0)
    k_q, k_kv, k_p, k_q2, k_kv2 = jax.random.split(root, 5)

    raw_params = make_params(k_p)
    prepared = prepare_params(raw_params)

    # --- small-shape test (matches the module's expected tiny batch) ---
    B, H = 8, HIDDEN
    query = jax.random.normal(k_q, (B, H), dtype=jnp.float32)
    key_value = jax.random.normal(k_kv, (B, H), dtype=jnp.float32)

    out = cross_attention_forward(query, key_value, prepared)
    out = jax.block_until_ready(out)
    ref = reference_forward(query, key_value, raw_params)
    np.testing.assert_allclose(np.asarray(out), np.asarray(ref),
                               rtol=1e-4, atol=1e-4)

    # --- larger batch exercising the tiled grid + padding path ---
    B2 = 300
    query2 = jax.random.normal(k_q2, (B2, H), dtype=jnp.float32)
    key_value2 = jax.random.normal(k_kv2, (B2, H), dtype=jnp.float32)

    out2 = cross_attention_forward(query2, key_value2, prepared, block_b=128)
    out2 = jax.block_until_ready(out2)
    ref2 = reference_forward(query2, key_value2, raw_params)
    np.testing.assert_allclose(np.asarray(out2), np.asarray(ref2),
                               rtol=1e-4, atol=1e-4)

    print("KERNEL_OK")
</pallas_src>

<mosaic_0001>
module attributes {stable_mosaic.version = 11 : i64} {
  func.func @cross_attention_kernel(%arg0: i32, %arg1: memref<8x32xf32, #tpu.memory_space<vmem>>, %arg2: memref<8x32xf32, #tpu.memory_space<vmem>>, %arg3: memref<32x32xf32, #tpu.memory_space<vmem>>, %arg4: memref<6x32xf32, #tpu.memory_space<vmem>>, %arg5: memref<32x128xf32, #tpu.memory_space<vmem>>, %arg6: memref<1x128xf32, #tpu.memory_space<vmem>>, %arg7: memref<128x32xf32, #tpu.memory_space<vmem>>, %arg8: memref<8x32xf32, #tpu.memory_space<vmem>>) attributes {dimension_semantics = [#tpu.dimension_semantics<parallel>], iteration_bounds = array<i64: 1>, scalar_prefetch = 0 : i64, scratch_operands = 0 : i64, tpu.core_type = #tpu.core_type<tc>, window_params = [{transform_indices = @transform_0, window_bounds = array<i64: 8, 32>}, {transform_indices = @transform_1, window_bounds = array<i64: 8, 32>}, {pipeline_mode = #tpu.pipeline_mode<synchronous>, transform_indices = @transform_2, window_bounds = array<i64: 32, 32>}, {pipeline_mode = #tpu.pipeline_mode<synchronous>, transform_indices = @transform_3, window_bounds = array<i64: 6, 32>}, {pipeline_mode = #tpu.pipeline_mode<synchronous>, transform_indices = @transform_4, window_bounds = array<i64: 32, 128>}, {pipeline_mode = #tpu.pipeline_mode<synchronous>, transform_indices = @transform_5, window_bounds = array<i64: 1, 128>}, {pipeline_mode = #tpu.pipeline_mode<synchronous>, transform_indices = @transform_6, window_bounds = array<i64: 128, 32>}, {transform_indices = @transform_7, window_bounds = array<i64: 8, 32>}]} {
    %c0 = arith.constant 0 : index
    %c0_0 = arith.constant 0 : index
    %0 = vector.load %arg1[%c0, %c0_0] : memref<8x32xf32, #tpu.memory_space<vmem>>, vector<8x32xf32>
    %c0_1 = arith.constant 0 : index
    %c0_2 = arith.constant 0 : index
    %1 = vector.load %arg2[%c0_1, %c0_2] : memref<8x32xf32, #tpu.memory_space<vmem>>, vector<8x32xf32>
    %c0_3 = arith.constant 0 : index
    %c0_4 = arith.constant 0 : index
    %2 = vector.load %arg4[%c0_3, %c0_4] : memref<6x32xf32, #tpu.memory_space<vmem>>, vector<6x32xf32>
    %3 = vector.extract_strided_slice %2 {offsets = [0, 0], sizes = [1, 32], strides = [1, 1]} : vector<6x32xf32> to vector<1x32xf32>
    %4 = vector.extract_strided_slice %2 {offsets = [1, 0], sizes = [1, 32], strides = [1, 1]} : vector<6x32xf32> to vector<1x32xf32>
    %5 = vector.extract_strided_slice %2 {offsets = [2, 0], sizes = [1, 32], strides = [1, 1]} : vector<6x32xf32> to vector<1x32xf32>
    %6 = vector.extract_strided_slice %2 {offsets = [3, 0], sizes = [1, 32], strides = [1, 1]} : vector<6x32xf32> to vector<1x32xf32>
    %7 = vector.extract_strided_slice %2 {offsets = [4, 0], sizes = [1, 32], strides = [1, 1]} : vector<6x32xf32> to vector<1x32xf32>
    %8 = vector.extract_strided_slice %2 {offsets = [5, 0], sizes = [1, 32], strides = [1, 1]} : vector<6x32xf32> to vector<1x32xf32>
    %c0_5 = arith.constant 0 : index
    %c0_6 = arith.constant 0 : index
    %9 = vector.load %arg3[%c0_5, %c0_6] : memref<32x32xf32, #tpu.memory_space<vmem>>, vector<32x32xf32>
    %cst = arith.constant dense<0.000000e+00> : vector<8x32xf32>
    %10 = tpu.matmul %1, %9, %cst {dimension_numbers = #tpu.dot_dimension_numbers<[1], [0], [0], [1], [0, 0, 1, 1], [], []>} : vector<8x32xf32>, vector<32x32xf32>, vector<8x32xf32> -> vector<8x32xf32>
    %11 = vector.broadcast %3 : vector<1x32xf32> to vector<8x32xf32>
    %12 = arith.addf %10, %11 : vector<8x32xf32>
    %13 = arith.addf %0, %12 : vector<8x32xf32>
    %cst_7 = arith.constant dense<0.000000e+00> : vector<8xf32>
    %14 = vector.multi_reduction <add>, %13, %cst_7 [1] : vector<8x32xf32> to vector<8xf32>
    %15 = vector.shape_cast %14 : vector<8xf32> to vector<8x1xf32>
    %cst_8 = arith.constant 3.200000e+01 : f32
    %16 = vector.broadcast %cst_8 : f32 to vector<8x1xf32>
    %17 = arith.divf %15, %16 : vector<8x1xf32>
    %18 = vector.broadcast %17 : vector<8x1xf32> to vector<8x32xf32>
    %19 = arith.subf %13, %18 : vector<8x32xf32>
    %20 = arith.mulf %19, %19 : vector<8x32xf32>
    %cst_9 = arith.constant dense<0.000000e+00> : vector<8xf32>
    %21 = vector.multi_reduction <add>, %20, %cst_9 [1] : vector<8x32xf32> to vector<8xf32>
    %22 = vector.shape_cast %21 : vector<8xf32> to vector<8x1xf32>
    %cst_10 = arith.constant 3.200000e+01 : f32
    %23 = vector.broadcast %cst_10 : f32 to vector<8x1xf32>
    %24 = arith.divf %22, %23 : vector<8x1xf32>
    %25 = vector.broadcast %17 : vector<8x1xf32> to vector<8x32xf32>
    %26 = arith.subf %13, %25 : vector<8x32xf32>
    %cst_11 = arith.constant 9.99999974E-6 : f32
    %27 = vector.broadcast %cst_11 : f32 to vector<8x1xf32>
    %28 = arith.addf %24, %27 : vector<8x1xf32>
    %29 = math.rsqrt %28 : vector<8x1xf32>
    %30 = vector.broadcast %29 : vector<8x1xf32> to vector<8x32xf32>
    %31 = arith.mulf %26, %30 : vector<8x32xf32>
    %32 = vector.broadcast %4 : vector<1x32xf32> to vector<8x32xf32>
    %33 = arith.mulf %31, %32 : vector<8x32xf32>
    %34 = vector.broadcast %5 : vector<1x32xf32> to vector<8x32xf32>
    %35 = arith.addf %33, %34 : vector<8x32xf32>
    %c0_12 = arith.constant 0 : index
    %c0_13 = arith.constant 0 : index
    %36 = vector.load %arg5[%c0_12, %c0_13] : memref<32x128xf32, #tpu.memory_space<vmem>>, vector<32x128xf32>
    %cst_14 = arith.constant dense<0.000000e+00> : vector<8x128xf32>
    %37 = tpu.matmul %35, %36, %cst_14 {dimension_numbers = #tpu.dot_dimension_numbers<[1], [0], [0], [1], [0, 0, 1, 1], [], []>} : vector<8x32xf32>, vector<32x128xf32>, vector<8x128xf32> -> vector<8x128xf32>
    %c0_15 = arith.constant 0 : index
    %c0_16 = arith.constant 0 : index
    %38 = vector.load %arg6[%c0_15, %c0_16] : memref<1x128xf32, #tpu.memory_space<vmem>>, vector<1x128xf32>
    %39 = vector.broadcast %38 : vector<1x128xf32> to vector<8x128xf32>
    %40 = arith.addf %37, %39 : vector<8x128xf32>
    %cst_17 = arith.constant 0.000000e+00 : f32
    %41 = vector.broadcast %cst_17 : f32 to vector<8x128xf32>
    %42 = arith.maximumf %40, %41 : vector<8x128xf32>
    %c0_18 = arith.constant 0 : index
    %c0_19 = arith.constant 0 : index
    %43 = vector.load %arg7[%c0_18, %c0_19] : memref<128x32xf32, #tpu.memory_space<vmem>>, vector<128x32xf32>
    %cst_20 = arith.constant dense<0.000000e+00> : vector<8x32xf32>
    %44 = tpu.matmul %42, %43, %cst_20 {dimension_numbers = #tpu.dot_dimension_numbers<[1], [0], [0], [1], [0, 0, 1, 1], [], []>} : vector<8x128xf32>, vector<128x32xf32>, vector<8x32xf32> -> vector<8x32xf32>
    %45 = vector.broadcast %6 : vector<1x32xf32> to vector<8x32xf32>
    %46 = arith.addf %44, %45 : vector<8x32xf32>
    %47 = arith.addf %35, %46 : vector<8x32xf32>
    %cst_21 = arith.constant dense<0.000000e+00> : vector<8xf32>
    %48 = vector.multi_reduction <add>, %47, %cst_21 [1] : vector<8x32xf32> to vector<8xf32>
    %49 = vector.shape_cast %48 : vector<8xf32> to vector<8x1xf32>
    %cst_22 = arith.constant 3.200000e+01 : f32
    %50 = vector.broadcast %cst_22 : f32 to vector<8x1xf32>
    %51 = arith.divf %49, %50 : vector<8x1xf32>
    %52 = vector.broadcast %51 : vector<8x1xf32> to vector<8x32xf32>
    %53 = arith.subf %47, %52 : vector<8x32xf32>
    %54 = arith.mulf %53, %53 : vector<8x32xf32>
    %cst_23 = arith.constant dense<0.000000e+00> : vector<8xf32>
    %55 = vector.multi_reduction <add>, %54, %cst_23 [1] : vector<8x32xf32> to vector<8xf32>
    %56 = vector.shape_cast %55 : vector<8xf32> to vector<8x1xf32>
    %cst_24 = arith.constant 3.200000e+01 : f32
    %57 = vector.broadcast %cst_24 : f32 to vector<8x1xf32>
    %58 = arith.divf %56, %57 : vector<8x1xf32>
    %59 = vector.broadcast %51 : vector<8x1xf32> to vector<8x32xf32>
    %60 = arith.subf %47, %59 : vector<8x32xf32>
    %cst_25 = arith.constant 9.99999974E-6 : f32
    %61 = vector.broadcast %cst_25 : f32 to vector<8x1xf32>
    %62 = arith.addf %58, %61 : vector<8x1xf32>
    %63 = math.rsqrt %62 : vector<8x1xf32>
    %64 = vector.broadcast %63 : vector<8x1xf32> to vector<8x32xf32>
    %65 = arith.mulf %60, %64 : vector<8x32xf32>
    %66 = vector.broadcast %7 : vector<1x32xf32> to vector<8x32xf32>
    %67 = arith.mulf %65, %66 : vector<8x32xf32>
    %68 = vector.broadcast %8 : vector<1x32xf32> to vector<8x32xf32>
    %69 = arith.addf %67, %68 : vector<8x32xf32>
    %c0_26 = arith.constant 0 : index
    %c0_27 = arith.constant 0 : index
    %70 = vector.load %arg8[%c0_26, %c0_27] : memref<8x32xf32, #tpu.memory_space<vmem>>, vector<8x32xf32>
    tpu.vector_store %arg8[%c0_26, %c0_27], %69 {strides = array<i32>} : memref<8x32xf32, #tpu.memory_space<vmem>>, vector<8x32xf32>,
    return
  }
  func.func @transform_0(%arg0: i32) -> (i32, i32) {
    %c0_i32 = arith.constant 0 : i32
    %c0_i32_0 = arith.constant 0 : i32
    return %arg0, %c0_i32 : i32, i32
  }
  func.func @transform_1(%arg0: i32) -> (i32, i32) {
    %c0_i32 = arith.constant 0 : i32
    %c0_i32_0 = arith.constant 0 : i32
    return %arg0, %c0_i32 : i32, i32
  }
  func.func @transform_2(%arg0: i32) -> (i32, i32) {
    %c0_i32 = arith.constant 0 : i32
    %c0_i32_0 = arith.constant 0 : i32
    %c0_i32_1 = arith.constant 0 : i32
    return %c0_i32, %c0_i32_0 : i32, i32
  }
  func.func @transform_3(%arg0: i32) -> (i32, i32) {
    %c0_i32 = arith.constant 0 : i32
    %c0_i32_0 = arith.constant 0 : i32
    %c0_i32_1 = arith.constant 0 : i32
    return %c0_i32, %c0_i32_0 : i32, i32
  }
  func.func @transform_4(%arg0: i32) -> (i32, i32) {
    %c0_i32 = arith.constant 0 : i32
    %c0_i32_0 = arith.constant 0 : i32
    %c0_i32_1 = arith.constant 0 : i32
    return %c0_i32, %c0_i32_0 : i32, i32
  }
  func.func @transform_5(%arg0: i32) -> (i32, i32) {
    %c0_i32 = arith.constant 0 : i32
    %c0_i32_0 = arith.constant 0 : i32
    %c0_i32_1 = arith.constant 0 : i32
    return %c0_i32, %c0_i32_0 : i32, i32
  }
  func.func @transform_6(%arg0: i32) -> (i32, i32) {
    %c0_i32 = arith.constant 0 : i32
    %c0_i32_0 = arith.constant 0 : i32
    %c0_i32_1 = arith.constant 0 : i32
    return %c0_i32, %c0_i32_0 : i32, i32
  }
  func.func @transform_7(%arg0: i32) -> (i32, i32) {
    %c0_i32 = arith.constant 0 : i32
    %c0_i32_0 = arith.constant 0 : i32
    return %arg0, %c0_i32 : i32, i32
  }
}

</mosaic_0001>

<bundles_post_ra>
// kernel: tpu_custom_call.1
= control target key start
LH: loop header
LB: loop body
LE: loop exit
PB: predicated region body
PF: predicated region fallthrough
CT: control target
= control target key end

     0   :  { %s393_s0 = inlined_call_operand.vmem [shape: f32[8,32], index: 0, kind: input, shape index: {}]   ;;  %s394_s1 = inlined_call_operand.vmem [shape: f32[8,32], index: 1, kind: input, shape index: {}]   ;;  %s395_s2 = inlined_call_operand.vmem [shape: f32[32,32], index: 2, kind: input, shape index: {}]   ;;  %s396_s3 = inlined_call_operand.vmem [shape: f32[6,32], index: 3, kind: input, shape index: {}]   ;;  %s397_s4 = inlined_call_operand.vmem [shape: f32[32,128], index: 4, kind: input, shape index: {}]   ;;  %s398_s5 = inlined_call_operand.vmem [shape: f32[1,128], index: 5, kind: input, shape index: {}]   ;;  %s399_s6 = inlined_call_operand.vmem [shape: f32[128,32], index: 6, kind: input, shape index: {}]   ;;  %s400_s7 = inlined_call_operand.hbm [shape: f32[8,32], index: 7, kind: output, shape index: {}]  }
   0x1   :  { %v33_v0 = vld [vmem:[%s395_s2 + $0x18] sm:$0xff]  ;;  %v32_v1 = vld [vmem:[%s395_s2 + $0x10] sm:$0xff]  ;;  %v31_v2 = vld [vmem:[%s395_s2 + $0x8] sm:$0xff] }
   0x2   :  { %51 = vmatpush.msra.mxu0 %v33_v0 }
   0x3   :  { %12 = vsyncpa [#allocation3], 0  ;;  %v30_v3 = vld [vmem:[%s395_s2] sm:$0xff]  ;;  %vm35_vm0 = vcmask 261120   ;;  %v243_v12 = vmov 32.0   ;;  %v96_v24 = vld [vmem:[%s397_s4 + $0x18] sm:$0xff] }
   0x4   :  { %52 = vmatpush.msra.mxu0 %v32_v1  ;;  %v28_v4 = vld [vmem:[%s394_s1] sm:$0xff]  ;;  %211 = vrcp.f32 %v243_v12  ;;  %116 = vmatpush.msra.mxu1 %v96_v24  ;;  %v95_v25 = vld [vmem:[%s397_s4 + $0x10] sm:$0xff]  ;;  %v94_v26 = vld [vmem:[%s397_s4 + $0x8] sm:$0xff]  ;;  %s197_s26 = sshll.u32 %s400_s7, 4  ;;  %s198_s26 = int_to_ptr.hbm [resolvable:$true] %s197_s26 }
   0x5   :  { %v304_v5 = vld [vmem:[%s396_s3] sm:$0x3f]  ;;  %v140_v28 = vld [vmem:[%s399_s6 + $0x78] sm:$0xff]  ;;  %v139_v29 = vld [vmem:[%s399_s6 + $0x70] sm:$0xff] }
   0x6   :  { %53 = vmatpush.msra.mxu0 %v31_v2  ;;  %v34_v6 = vperm.slane %v304_v5, 0  ;;  %v27_v8 = vld [vmem:[%s393_s0] sm:$0xff]  ;;  %117 = vmatpush.msra.mxu1 %v95_v25  ;;  %v138_v30 = vld [vmem:[%s399_s6 + $0x68] sm:$0xff]  ;;  %v136_v35 = vld [vmem:[%s399_s6 + $0x58] sm:$0xff]  ;;  %v89_v50 = vperm.slane %v304_v5, 1  ;;  %v91_v53 = vperm.slane %v304_v5, 2 }
   0x7   :  { %v93_v27 = vld [vmem:[%s397_s4] sm:$0xff]  ;;  %142 = vmatpush.msra.mxu2 %v140_v28  ;;  %v135_v36 = vld [vmem:[%s399_s6 + $0x50] sm:$0xff]  ;;  %v134_v37 = vld [vmem:[%s399_s6 + $0x48] sm:$0xff]  ;;  %v141_v63 = vperm.slane %v304_v5, 3 }
   0x8   :  { %54 = vmatpush.msra.mxu0 %v30_v3  ;;  %118 = vmatpush.msra.mxu1 %v94_v26  ;;  %v137_v33 = vld [vmem:[%s399_s6 + $0x60] sm:$0xff]  ;;  %v132_v40 = vld [vmem:[%s399_s6 + $0x38] sm:$0xff]  ;;  %v131_v42 = vld [vmem:[%s399_s6 + $0x30] sm:$0xff] }
   0x9   :  { %206 = vmatmul.msk.f32.vlgmr.msra.gmra.mxu0 %vm35_vm0, %v28_v4  ;;  %143 = vmatpush.msra.mxu2 %v139_v29  ;;  %v133_v38 = vld [vmem:[%s399_s6 + $0x40] sm:$0xff]  ;;  %v130_v44 = vld [vmem:[%s399_s6 + $0x28] sm:$0xff]  ;;  %v128_v48 = vld [vmem:[%s399_s6 + $0x18] sm:$0xff] }
   0xa   :  { %v212_v13 = vpop.eup %211  ;;  %119 = vmatpush.msra.mxu1 %v93_v27  ;;  %v129_v46 = vld [vmem:[%s399_s6 + $0x20] sm:$0xff]  ;;  %v127_v56 = vld [vmem:[%s399_s6 + $0x10] sm:$0xff]  ;;  %v126_v57 = vld [vmem:[%s399_s6 + $0x8] sm:$0xff] }
   0xb   :  { %v64_v14 = vmul.f32 32.0, %v212_v13  ;;  %vm68_vm1 = vweird.f32 %v212_v13  ;;  %144 = vmatpush.msra.mxu2 %v138_v30  ;;  %v125_v58 = vld [vmem:[%s399_s6] sm:$0xff] }
   0xc   :  { %v210_v59 = vld [vmem:[%s398_s5] ss:$0 sm:$0xff]  ;;  %s244_s5 = smov [#allocation2]  }
   0xd   :  { %v65_v15 = vsub.f32 1.0, %v64_v14  ;;  %145 = vmatpush.msra.mxu2 %v137_v33  ;;  %s195_s6 = sshll.u32 %s244_s5, 4  ;;  %s196_s6 = int_to_ptr.vmem [resolvable:$true] %s195_s6 }
   0xf   :  { %v66_v16 = vmul.f32 %v212_v13, %v65_v15  ;;  %146 = vmatpush.msra.mxu2 %v136_v35 }
  0x11   :  { %v67_v17 = vadd.f32 %v212_v13, %v66_v16  ;;  %147 = vmatpush.msra.mxu2 %v135_v36 }
  0x13   :  { %v311_v18 = vsel %vm68_vm1, %v212_v13, %v67_v17  ;;  %148 = vmatpush.msra.mxu2 %v134_v37 }
  0x15   :  { %149 = vmatpush.msra.mxu2 %v133_v38 }
  0x17   :  { %150 = vmatpush.msra.mxu2 %v132_v40 }
  0x19   :  { %151 = vmatpush.msra.mxu2 %v131_v42 }
  0x1b   :  { %152 = vmatpush.msra.mxu2 %v130_v44 }
  0x1d   :  { %153 = vmatpush.msra.mxu2 %v129_v46 }
  0x1f   :  { %154 = vmatpush.msra.mxu2 %v128_v48 }
  0x21   :  { %155 = vmatpush.msra.mxu2 %v127_v56 }
  0x23   :  { %156 = vmatpush.msra.mxu2 %v126_v57 }
  0x25   :  { %157 = vmatpush.msra.mxu2 %v125_v58 }
  0x86   :  { %v56_v7 = vpop.f32.mrf.mxu0 }
  0x87   :  { %v57_v9 = vadd.f32 %v56_v7, %v34_v6 }
  0x89   :  { %v59_v10 = vadd.f32 %v57_v9, %v27_v8 }
  0x8b   :  { %v60_v11 = vsel %vm35_vm0, %v59_v10, 0.0 }
  0x8c   :  { %61 = vadd.xlane.f32.xlu0 %v60_v11 }
  0xff   :  { %v62_v19 = vpop.xlane.xlu0 %61 }
 0x100   :  { %v70_v20 = vmul.f32 %v311_v18, %v62_v19 }
 0x102   :  { %v71_v21 = vsub.f32 %v59_v10, %v70_v20  ;;  %v185_v20 = vperm.slane %v304_v5, 4 }
 0x104   :  { %v72_v22 = vmul.f32 %v71_v21, %v71_v21 }
 0x106   :  { %v73_v23 = vsel %vm35_vm0, %v72_v22, 0.0 }
 0x107   :  { %74 = vadd.xlane.f32.xlu0 %v73_v23  ;;  %v187_v23 = vperm.slane %v304_v5, 5 }
 0x17a   :  { %v75_v31 = vpop.xlane.xlu0 %74 }
 0x17b   :  { %v76_v32 = vmul.f32 %v75_v31, %v311_v18 }
 0x17d   :  { %v77_v34 = vadd.f32 1e-05, %v76_v32 }
 0x17f   :  { %213 = vrsqrt.f32 %v77_v34  ;;  %vm84_vm3 = vweird.f32 %v77_v34 }
 0x185   :  { %v214_v39 = vpop.eup %213 }
 0x186   :  { %v79_v41 = vmul.f32 %v214_v39, %v77_v34  ;;  %vm85_vm2 = vweird.f32 %v214_v39 }
 0x187   :  { %vm86_vm4 = vmor %vm84_vm3, %vm85_vm2 }
 0x188   :  { %v80_v43 = vmul.f32 %v214_v39, %v79_v41 }
 0x18a   :  { %v81_v45 = vmul.f32 0.5, %v80_v43 }
 0x18c   :  { %v82_v47 = vsub.f32 1.5, %v81_v45 }
 0x18e   :  { %v83_v49 = vmul.f32 %v214_v39, %v82_v47 }
 0x190   :  { %v87_v51 = vsel %vm86_vm4, %v214_v39, %v83_v49 }
 0x191   :  { %v88_v52 = vmul.f32 %v87_v51, %v71_v21 }
 0x193   :  { %v90_v54 = vmul.f32 %v89_v50, %v88_v52 }
 0x195   :  { %v92_v55 = vadd.f32 %v91_v53, %v90_v54 }
 0x197   :  { %207 = vmatmul.msk.f32.vlgmr.msra.gmra.mxu1 %vm35_vm0, %v92_v55 }
 0x214   :  { %v121_v60 = vpop.f32.mrf.mxu1 }
 0x215   :  { %v122_v61 = vadd.f32 %v210_v59, %v121_v60 }
 0x217   :  { %v124_v62 = vmax.f32 %v122_v61, 0.0 }
 0x219   :  { %158 = vmatmul.f32.vlgmr.msra.gmra.mxu2 %v124_v62 }
 0x29c   :  { %v159_v0 = vpop.f32.mrf.mxu2 }
 0x29d   :  { %v160_v1 = vadd.f32 %v159_v0, %v141_v63 }
 0x29f   :  { %v162_v2 = vadd.f32 %v160_v1, %v92_v55 }
 0x2a1   :  { %v163_v3 = vsel %vm35_vm0, %v162_v2, 0.0 }
 0x2a2   :  { %164 = vadd.xlane.f32.xlu1 %v163_v3 }
 0x315   :  { %v165_v4 = vpop.xlane.xlu1 %164 }
 0x316   :  { %v166_v6 = vmul.f32 %v165_v4, %v311_v18 }
 0x318   :  { %v167_v7 = vsub.f32 %v162_v2, %v166_v6 }
 0x31a   :  { %v168_v8 = vmul.f32 %v167_v7, %v167_v7 }
 0x31c   :  { %v169_v9 = vsel %vm35_vm0, %v168_v8, 0.0 }
 0x31d   :  { %170 = vadd.xlane.f32.xlu1 %v169_v9 }
 0x390   :  { %v171_v10 = vpop.xlane.xlu1 %170 }
 0x391   :  { %v172_v11 = vmul.f32 %v171_v10, %v311_v18 }
 0x393   :  { %v173_v12 = vadd.f32 1e-05, %v172_v11 }
 0x395   :  { %215 = vrsqrt.f32 %v173_v12  ;;  %vm180_vm6 = vweird.f32 %v173_v12 }
 0x39b   :  { %v216_v13 = vpop.eup %215 }
 0x39c   :  { %v175_v14 = vmul.f32 %v216_v13, %v173_v12  ;;  %vm181_vm5 = vweird.f32 %v216_v13 }
 0x39d   :  { %vm182_vm7 = vmor %vm180_vm6, %vm181_vm5 }
 0x39e   :  { %v176_v15 = vmul.f32 %v216_v13, %v175_v14 }
 0x3a0   :  { %v177_v16 = vmul.f32 0.5, %v176_v15 }
 0x3a2   :  { %v178_v17 = vsub.f32 1.5, %v177_v16 }
 0x3a4   :  { %v179_v19 = vmul.f32 %v216_v13, %v178_v17 }
 0x3a6   :  { %v183_v21 = vsel %vm182_vm7, %v216_v13, %v179_v19 }
 0x3a7   :  { %v184_v22 = vmul.f32 %v183_v21, %v167_v7 }
 0x3a9   :  { %v186_v18 = vmul.f32 %v185_v20, %v184_v22 }
 0x3ab   :  { %v188_v24 = vadd.f32 %v187_v23, %v186_v18 }
 0x3ad   :  { %189 = vst.msk [vmem:[#allocation2] sm:$0xff] %vm35_vm0, %v188_v24 }
 0x3ae   :  { %200 = dma.vmem_to_hbm [thread:$0]  %s196_s6, 128, %s198_s26, [#allocation3]  }
 0x3af   :  { %241 = dma.done.wait [#allocation3], 128  }
 0x3b0   :  { %242 = vsyncadd [#allocation3], 4294967168 }
 0x3b1   :  { %205 = vsyncpa [#allocation3], 1 }

</bundles_post_ra>
